<compile_context>
chip_gen: v7x
topology: tpu7x:2x2x1
jax: 0.10.0
libtpu: 0.0.40
codegen_flags: <defaults>
</compile_context>

<pallas_src>
import functools

import jax
import jax.numpy as jnp
from jax import lax
from jax.experimental import pallas as pl
from jax.experimental.pallas import tpu as pltpu


_LANES = 128
_ROWS_PER_CHUNK = 8          # 8 sublanes x 128 lanes = one full f32 vreg per class


def _vmem_capacity_bytes() -> int:
    """Per-core VMEM capacity; conservative (v7x, 64 MiB) fallback on failure."""
    try:
        info = pltpu.get_tpu_info()
        cap = int(getattr(info, "vmem_capacity_bytes", 0))
        if cap > 0:
            return cap
    except Exception:
        pass
    return 64 * 1024 * 1024


def _dice_partial_kernel(logits_ref, target_ref, inter_ref, denom_ref, *,
                         dhw: int, tiles_per_split: int,
                         emit_unmasked: bool, emit_masked: bool, unroll: int):
    """One grid step accumulates per-class partials for one (split, batch, row-tile).

    logits_ref : (1, C, TR, 128) native-dtype VMEM tile (TR rows of 128 positions)
    target_ref : (1, 1, TR, 128) native integer dtype
    inter_ref / denom_ref : (1, 1, C, 8, 128) f32 resident accumulator blocks
    """
    C = logits_ref.shape[1]
    TR = logits_ref.shape[2]
    RPC = _ROWS_PER_CHUNK
    n_chunks = TR // RPC

    s = pl.program_id(0)      # core-split index over the position range (parallel)
    j = pl.program_id(2)      # row-tile index within the split (reduction axis)

    @pl.when(j == 0)
    def _init():
        inter_ref[...] = jnp.zeros_like(inter_ref)
        denom_ref[...] = jnp.zeros_like(denom_ref)

    # Unclamped global row-tile index.  The DMA index_map clamps to stay in
    # bounds; here we keep the true index so duplicated / out-of-range tiles
    # compute positions >= dhw and mask themselves to zero.
    row_block = s * tiles_per_split + j
    tile_pos0 = row_block * (TR * _LANES)
    tile_end = tile_pos0 + TR * _LANES

    def accumulate(masked: bool):
        if masked:
            # Hoisted once per tile (JAX does not CSE iotas inside the loop).
            row_io = lax.broadcasted_iota(jnp.int32, (RPC, _LANES), 0)
            lane_io = lax.broadcasted_iota(jnp.int32, (RPC, _LANES), 1)
            intra = row_io * _LANES + lane_io        # offset within one chunk
            limit = dhw - tile_pos0                  # may be <= 0 (fully masked)

        zeros = jnp.zeros((RPC, _LANES), jnp.float32)
        init = (tuple(zeros for _ in range(C)), tuple(zeros for _ in range(C)))

        def chunk(k, carry):
            acc_i, acc_d = carry
            r0 = pl.multiple_of(k * RPC, RPC)

            # One full (8,128) plane per class: every VPU/EUP op runs on a
            # fully occupied vreg; the class reduction is element-wise across
            # planes (no cross-sublane XLU work).
            x = [logits_ref[0, c, pl.ds(r0, RPC), :].astype(jnp.float32)
                 for c in range(C)]
            m = x[0]
            for c in range(1, C):
                m = jnp.maximum(m, x[c])
            e = [jnp.exp(x[c] - m) for c in range(C)]
            ssum = e[0]
            for c in range(1, C):
                ssum = ssum + e[c]

            # EUP approximate reciprocal + two Newton steps: f32-accurate
            # normalization without a VALU divide.
            rinv = pl.reciprocal(ssum, approx=True)
            rinv = rinv * (2.0 - ssum * rinv)
            rinv = rinv * (2.0 - ssum * rinv)

            t = target_ref[0, 0, pl.ds(r0, RPC), :].astype(jnp.int32)

            if masked:
                valid = (intra + k * (RPC * _LANES)) < limit   # (RPC, 128) bool

            new_i = []
            new_d = []
            for c in range(C):
                p_c = e[c] * rinv
                oh_c = (t == c).astype(jnp.float32)
                if masked:
                    # Mask BOTH terms; garbage in the tail (possibly NaN/Inf)
                    # is dropped by the select and never reaches the sums.
                    p_c = jnp.where(valid, p_c, 0.0)
                    oh_c = jnp.where(valid, oh_c, 0.0)
                new_i.append(acc_i[c] + p_c * oh_c)
                new_d.append(acc_d[c] + (p_c + oh_c))
            return tuple(new_i), tuple(new_d)

        acc_i, acc_d = lax.fori_loop(0, n_chunks, chunk, init,
                                     unroll=max(1, min(unroll, n_chunks)))
        for c in range(C):
            inter_ref[0, 0, c] += acc_i[c]
            denom_ref[0, 0, c] += acc_d[c]

    if emit_unmasked and emit_masked:
        @pl.when(tile_end <= dhw)
        def _hot():
            accumulate(masked=False)

        @pl.when(tile_end > dhw)
        def _tail():
            accumulate(masked=True)
    elif emit_masked:
        accumulate(masked=True)
    else:
        accumulate(masked=False)


@functools.partial(jax.jit, static_argnames=("smooth", "max_rows_per_tile"))
def dice_loss(logits, target, *, smooth=1e-5, max_rows_per_tile=None):
    """logits: [B, C, D, H, W] float; target: [B, D, H, W] int -> scalar f32."""
    B, C, D, H, W = logits.shape
    DHW = D * H * W

    # ---- Layout: flatten spatial dims and view positions as (rows, 128). ----
    # Free (pure reshape) whenever DHW is a multiple of 128; only odd/tiny
    # volumes pay a single pad copy.  Target keeps its native integer dtype.
    R = max(pl.cdiv(DHW, _LANES), _ROWS_PER_CHUNK)
    P = R * _LANES
    logits_f = logits.reshape(B, C, DHW)
    target_f = target.reshape(B, 1, DHW)
    if P != DHW:
        pad = P - DHW
        logits_f = jnp.pad(logits_f, ((0, 0), (0, 0), (0, pad)))
        target_f = jnp.pad(target_f, ((0, 0), (0, 0), (0, pad)))
    logits4 = logits_f.reshape(B, C, R, _LANES)
    target4 = target_f.reshape(B, 1, R, _LANES)

    # ---- Tile sizing straight from the VMEM budget (per generation). --------
    vmem_cap = _vmem_capacity_bytes()
    vmem_limit = max(32 * 1024 * 1024, vmem_cap // 2)   # 32 MiB v7x, 64 MiB v5e/v6e
    tile_budget = vmem_limit // 4                       # double-buffered streams fit 2x
    bytes_per_row = _LANES * (C * jnp.dtype(logits.dtype).itemsize
                              + jnp.dtype(target.dtype).itemsize)
    tr = tile_budget // bytes_per_row
    tr_data = max((R // _ROWS_PER_CHUNK) * _ROWS_PER_CHUNK, _ROWS_PER_CHUNK)
    tr = min(tr, tr_data)
    if max_rows_per_tile is not None:
        tr = min(tr, int(max_rows_per_tile))
    tr = max(_ROWS_PER_CHUNK, (tr // _ROWS_PER_CHUNK) * _ROWS_PER_CHUNK)

    n_row_tiles = pl.cdiv(R, tr)

    # ---- v7x core split: keep both TensorCores busy even when B == 1. -------
    splits = 2 if (B == 1 and n_row_tiles >= 2) else 1
    tiles_per_split = pl.cdiv(n_row_tiles, splits)
    last_blk = n_row_tiles - 1

    emit_unmasked = (tr * _LANES) <= DHW
    emit_masked = (splits * tiles_per_split * tr * _LANES) > DHW

    kernel = functools.partial(
        _dice_partial_kernel, dhw=DHW, tiles_per_split=tiles_per_split,
        emit_unmasked=emit_unmasked, emit_masked=emit_masked, unroll=4)

    def row_idx(s, j):
        # Clamp the DMA window into bounds; duplicated tiles mask to zero
        # inside the kernel (their unclamped positions are >= DHW).
        return jnp.minimum(s * tiles_per_split + j, last_blk)

    out_shape = (
        jax.ShapeDtypeStruct((splits, B, C, _ROWS_PER_CHUNK, _LANES), jnp.float32),
        jax.ShapeDtypeStruct((splits, B, C, _ROWS_PER_CHUNK, _LANES), jnp.float32),
    )

    inter_p, denom_p = pl.pallas_call(
        kernel,
        out_shape=out_shape,
        grid_spec=pltpu.PrefetchScalarGridSpec(
            num_scalar_prefetch=0,
            grid=(splits, B, tiles_per_split),
            in_specs=[
                pl.BlockSpec((1, C, tr, _LANES),
                             lambda s, b, j: (b, 0, row_idx(s, j), 0)),
                pl.BlockSpec((1, 1, tr, _LANES),
                             lambda s, b, j: (b, 0, row_idx(s, j), 0)),
            ],
            out_specs=[
                pl.BlockSpec((1, 1, C, _ROWS_PER_CHUNK, _LANES),
                             lambda s, b, j: (s, b, 0, 0, 0)),
                pl.BlockSpec((1, 1, C, _ROWS_PER_CHUNK, _LANES),
                             lambda s, b, j: (s, b, 0, 0, 0)),
            ],
        ),
        compiler_params=pltpu.CompilerParams(
            dimension_semantics=("parallel", "parallel", "arbitrary"),
            vmem_limit_bytes=int(vmem_limit),
        ),
    )(logits4, target4)

    # Tiny epilogue: (splits, B, C, 8, 128) partials -> per-class sums -> loss.
    inter = jnp.sum(inter_p, axis=(0, 1, 3, 4))    # (C,)
    denom = jnp.sum(denom_p, axis=(0, 1, 3, 4))    # (C,)
    dice = (2.0 * inter + smooth) / (denom + smooth)
    return jnp.mean(1.0 - dice)


def dice_loss_ref(logits, target, smooth=1e-5):
    """Plain-JAX reference mirroring the PyTorch module."""
    num_classes = logits.shape[1]
    probs = jax.nn.softmax(logits.astype(jnp.float32), axis=1)
    onehot = jax.nn.one_hot(target, num_classes, dtype=jnp.float32)   # [B,D,H,W,C]
    onehot = jnp.moveaxis(onehot, -1, 1)                              # [B,C,D,H,W]
    dims = (0, 2, 3, 4)
    intersection = jnp.sum(probs * onehot, dims)
    denominator = jnp.sum(probs + onehot, dims)
    dice = (2.0 * intersection + smooth) / (denominator + smooth)
    return jnp.mean(1.0 - dice)


if __name__ == "__main__":
    key = jax.random.PRNGKey(0)

    cases = [
        # (B, C, D, H, W, extra kwargs)
        (2, 4, 4, 8, 8, {}),                           # DHW=256: pad + tail mask
        (1, 3, 5, 7, 9, {}),                           # ragged DHW=315, C=3
        (1, 4, 8, 16, 17, {"max_rows_per_tile": 8}),   # multi-tile reduction + core split
    ]
    for (B, C, D, H, W, kw) in cases:
        key, k1, k2 = jax.random.split(key, 3)
        logits = jax.random.normal(k1, (B, C, D, H, W), dtype=jnp.float32)
        target = jax.random.randint(k2, (B, D, H, W), 0, C, dtype=jnp.int32)

        out = jax.block_until_ready(dice_loss(logits, target, **kw))
        ref = jax.block_until_ready(dice_loss_ref(logits, target))
        assert jnp.allclose(out, ref, atol=1e-5, rtol=1e-5), (
            (B, C, D, H, W), float(out), float(ref))

    print("KERNEL_OK")
</pallas_src>

<mosaic_0001>
module attributes {stable_mosaic.version = 11 : i64} {
  func.func @_dice_partial_kernel(%arg0: i32, %arg1: i32, %arg2: i32, %arg3: memref<1x4x8x128xf32, #tpu.memory_space<vmem>>, %arg4: memref<1x1x8x128xi32, #tpu.memory_space<vmem>>, %arg5: memref<1x1x4x8x128xf32, #tpu.memory_space<vmem>>, %arg6: memref<1x1x4x8x128xf32, #tpu.memory_space<vmem>>) attributes {dimension_semantics = [#tpu.dimension_semantics<parallel>, #tpu.dimension_semantics<parallel>, #tpu.dimension_semantics<arbitrary>], iteration_bounds = array<i64: 1, 2, 1>, scalar_prefetch = 0 : i64, scratch_operands = 0 : i64, tpu.core_type = #tpu.core_type<tc>, window_params = [{transform_indices = @transform_0, window_bounds = array<i64: 1, 4, 8, 128>}, {transform_indices = @transform_1, window_bounds = array<i64: 1, 1, 8, 128>}, {transform_indices = @transform_2, window_bounds = array<i64: 1, 1, 4, 8, 128>}, {transform_indices = @transform_3, window_bounds = array<i64: 1, 1, 4, 8, 128>}]} {
    %c0_i32 = arith.constant 0 : i32
    %0 = arith.cmpi eq, %arg2, %c0_i32 : i32
    %1 = arith.extui %0 : i1 to i32
    %c0_i32_0 = arith.constant 0 : i32
    %2 = arith.cmpi ne, %1, %c0_i32_0 : i32
    scf.if %2 {
      %cst_107 = arith.constant 0.000000e+00 : f32
      %158 = vector.broadcast %cst_107 : f32 to vector<1x1x4x8x128xf32>
      %c0_108 = arith.constant 0 : index
      %c0_109 = arith.constant 0 : index
      %c0_110 = arith.constant 0 : index
      %c0_111 = arith.constant 0 : index
      %c0_112 = arith.constant 0 : index
      %159 = vector.load %arg5[%c0_108, %c0_109, %c0_110, %c0_111, %c0_112] : memref<1x1x4x8x128xf32, #tpu.memory_space<vmem>>, vector<1x1x4x8x128xf32>
      tpu.vector_store %arg5[%c0_108, %c0_109, %c0_110, %c0_111, %c0_112], %158 {strides = array<i32>} : memref<1x1x4x8x128xf32, #tpu.memory_space<vmem>>, vector<1x1x4x8x128xf32>,
      %cst_113 = arith.constant 0.000000e+00 : f32
      %160 = vector.broadcast %cst_113 : f32 to vector<1x1x4x8x128xf32>
      %c0_114 = arith.constant 0 : index
      %c0_115 = arith.constant 0 : index
      %c0_116 = arith.constant 0 : index
      %c0_117 = arith.constant 0 : index
      %c0_118 = arith.constant 0 : index
      %161 = vector.load %arg6[%c0_114, %c0_115, %c0_116, %c0_117, %c0_118] : memref<1x1x4x8x128xf32, #tpu.memory_space<vmem>>, vector<1x1x4x8x128xf32>
      tpu.vector_store %arg6[%c0_114, %c0_115, %c0_116, %c0_117, %c0_118], %160 {strides = array<i32>} : memref<1x1x4x8x128xf32, #tpu.memory_space<vmem>>, vector<1x1x4x8x128xf32>,
    } else {
    }
    %c1_i32 = arith.constant 1 : i32
    %3 = arith.muli %arg0, %c1_i32 : i32
    %4 = arith.addi %3, %arg2 : i32
    %c1024_i32 = arith.constant 1024 : i32
    %5 = arith.muli %4, %c1024_i32 : i32
    %6 = tpu.iota {dimensions = array<i32: 0>} : vector<8x128xi32>
    %7 = tpu.iota {dimensions = array<i32: 1>} : vector<8x128xi32>
    %c128_i32 = arith.constant 128 : i32
    %8 = vector.broadcast %c128_i32 : i32 to vector<8x128xi32>
    %9 = arith.muli %6, %8 : vector<8x128xi32>
    %10 = arith.addi %9, %7 : vector<8x128xi32>
    %c256_i32 = arith.constant 256 : i32
    %11 = arith.subi %c256_i32, %5 : i32
    %cst = arith.constant 0.000000e+00 : f32
    %12 = vector.broadcast %cst : f32 to vector<8x128xf32>
    %c0_i32_1 = arith.constant 0 : i32
    %c8_i32 = arith.constant 8 : i32
    %13 = arith.muli %c0_i32_1, %c8_i32 : i32
    %14 = tpu.assume_multiple %13, 8 : i32
    %c0 = arith.constant 0 : index
    %c0_2 = arith.constant 0 : index
    %15 = arith.index_cast %14 : i32 to index
    %c0_3 = arith.constant 0 : index
    %16 = vector.load %arg3[%c0, %c0_2, %15, %c0_3] : memref<1x4x8x128xf32, #tpu.memory_space<vmem>>, vector<1x1x8x128xf32>
    %17 = vector.shape_cast %16 : vector<1x1x8x128xf32> to vector<8x128xf32>
    %c0_4 = arith.constant 0 : index
    %c1 = arith.constant 1 : index
    %18 = arith.index_cast %14 : i32 to index
    %c0_5 = arith.constant 0 : index
    %19 = vector.load %arg3[%c0_4, %c1, %18, %c0_5] : memref<1x4x8x128xf32, #tpu.memory_space<vmem>>, vector<1x1x8x128xf32>
    %20 = vector.shape_cast %19 : vector<1x1x8x128xf32> to vector<8x128xf32>
    %c0_6 = arith.constant 0 : index
    %c2 = arith.constant 2 : index
    %21 = arith.index_cast %14 : i32 to index
    %c0_7 = arith.constant 0 : index
    %22 = vector.load %arg3[%c0_6, %c2, %21, %c0_7] : memref<1x4x8x128xf32, #tpu.memory_space<vmem>>, vector<1x1x8x128xf32>
    %23 = vector.shape_cast %22 : vector<1x1x8x128xf32> to vector<8x128xf32>
    %c0_8 = arith.constant 0 : index
    %c3 = arith.constant 3 : index
    %24 = arith.index_cast %14 : i32 to index
    %c0_9 = arith.constant 0 : index
    %25 = vector.load %arg3[%c0_8, %c3, %24, %c0_9] : memref<1x4x8x128xf32, #tpu.memory_space<vmem>>, vector<1x1x8x128xf32>
    %26 = vector.shape_cast %25 : vector<1x1x8x128xf32> to vector<8x128xf32>
    %27 = arith.maximumf %17, %20 : vector<8x128xf32>
    %28 = arith.maximumf %27, %23 : vector<8x128xf32>
    %29 = arith.maximumf %28, %26 : vector<8x128xf32>
    %30 = arith.subf %17, %29 : vector<8x128xf32>
    %31 = math.exp %30 : vector<8x128xf32>
    %32 = arith.subf %20, %29 : vector<8x128xf32>
    %33 = math.exp %32 : vector<8x128xf32>
    %34 = arith.subf %23, %29 : vector<8x128xf32>
    %35 = math.exp %34 : vector<8x128xf32>
    %36 = arith.subf %26, %29 : vector<8x128xf32>
    %37 = math.exp %36 : vector<8x128xf32>
    %38 = arith.addf %31, %33 : vector<8x128xf32>
    %39 = arith.addf %38, %35 : vector<8x128xf32>
    %40 = arith.addf %39, %37 : vector<8x128xf32>
    %41 = tpu.reciprocal %40 {approx = true} : vector<8x128xf32> -> vector<8x128xf32>
    %42 = arith.mulf %40, %41 : vector<8x128xf32>
    %cst_10 = arith.constant 2.000000e+00 : f32
    %43 = vector.broadcast %cst_10 : f32 to vector<8x128xf32>
    %44 = arith.subf %43, %42 : vector<8x128xf32>
    %45 = arith.mulf %41, %44 : vector<8x128xf32>
    %46 = arith.mulf %40, %45 : vector<8x128xf32>
    %cst_11 = arith.constant 2.000000e+00 : f32
    %47 = vector.broadcast %cst_11 : f32 to vector<8x128xf32>
    %48 = arith.subf %47, %46 : vector<8x128xf32>
    %49 = arith.mulf %45, %48 : vector<8x128xf32>
    %c0_12 = arith.constant 0 : index
    %c0_13 = arith.constant 0 : index
    %50 = arith.index_cast %14 : i32 to index
    %c0_14 = arith.constant 0 : index
    %51 = vector.load %arg4[%c0_12, %c0_13, %50, %c0_14] : memref<1x1x8x128xi32, #tpu.memory_space<vmem>>, vector<1x1x8x128xi32>
    %52 = vector.shape_cast %51 : vector<1x1x8x128xi32> to vector<8x128xi32>
    %c1024_i32_15 = arith.constant 1024 : i32
    %53 = arith.muli %c0_i32_1, %c1024_i32_15 : i32
    %54 = vector.broadcast %53 : i32 to vector<8x128xi32>
    %55 = arith.addi %10, %54 : vector<8x128xi32>
    %56 = vector.broadcast %11 : i32 to vector<8x128xi32>
    %57 = arith.cmpi slt, %55, %56 : vector<8x128xi32>
    %58 = arith.mulf %31, %49 : vector<8x128xf32>
    %c0_i32_16 = arith.constant 0 : i32
    %59 = vector.broadcast %c0_i32_16 : i32 to vector<8x128xi32>
    %60 = arith.cmpi eq, %52, %59 : vector<8x128xi32>
    %61 = arith.extui %60 : vector<8x128xi1> to vector<8x128xi32>
    %62 = arith.sitofp %61 : vector<8x128xi32> to vector<8x128xf32>
    %cst_17 = arith.constant 0.000000e+00 : f32
    %63 = vector.broadcast %cst_17 : f32 to vector<8x128xf32>
    %64 = arith.select %57, %58, %63 : vector<8x128xi1>, vector<8x128xf32>
    %cst_18 = arith.constant 0.000000e+00 : f32
    %65 = vector.broadcast %cst_18 : f32 to vector<8x128xf32>
    %66 = arith.select %57, %62, %65 : vector<8x128xi1>, vector<8x128xf32>
    %67 = arith.mulf %64, %66 : vector<8x128xf32>
    %68 = arith.addf %12, %67 : vector<8x128xf32>
    %69 = arith.addf %64, %66 : vector<8x128xf32>
    %70 = arith.addf %12, %69 : vector<8x128xf32>
    %71 = arith.mulf %33, %49 : vector<8x128xf32>
    %c1_i32_19 = arith.constant 1 : i32
    %72 = vector.broadcast %c1_i32_19 : i32 to vector<8x128xi32>
    %73 = arith.cmpi eq, %52, %72 : vector<8x128xi32>
    %74 = arith.extui %73 : vector<8x128xi1> to vector<8x128xi32>
    %75 = arith.sitofp %74 : vector<8x128xi32> to vector<8x128xf32>
    %cst_20 = arith.constant 0.000000e+00 : f32
    %76 = vector.broadcast %cst_20 : f32 to vector<8x128xf32>
    %77 = arith.select %57, %71, %76 : vector<8x128xi1>, vector<8x128xf32>
    %cst_21 = arith.constant 0.000000e+00 : f32
    %78 = vector.broadcast %cst_21 : f32 to vector<8x128xf32>
    %79 = arith.select %57, %75, %78 : vector<8x128xi1>, vector<8x128xf32>
    %80 = arith.mulf %77, %79 : vector<8x128xf32>
    %81 = arith.addf %12, %80 : vector<8x128xf32>
    %82 = arith.addf %77, %79 : vector<8x128xf32>
    %83 = arith.addf %12, %82 : vector<8x128xf32>
    %84 = arith.mulf %35, %49 : vector<8x128xf32>
    %c2_i32 = arith.constant 2 : i32
    %85 = vector.broadcast %c2_i32 : i32 to vector<8x128xi32>
    %86 = arith.cmpi eq, %52, %85 : vector<8x128xi32>
    %87 = arith.extui %86 : vector<8x128xi1> to vector<8x128xi32>
    %88 = arith.sitofp %87 : vector<8x128xi32> to vector<8x128xf32>
    %cst_22 = arith.constant 0.000000e+00 : f32
    %89 = vector.broadcast %cst_22 : f32 to vector<8x128xf32>
    %90 = arith.select %57, %84, %89 : vector<8x128xi1>, vector<8x128xf32>
    %cst_23 = arith.constant 0.000000e+00 : f32
    %91 = vector.broadcast %cst_23 : f32 to vector<8x128xf32>
    %92 = arith.select %57, %88, %91 : vector<8x128xi1>, vector<8x128xf32>
    %93 = arith.mulf %90, %92 : vector<8x128xf32>
    %94 = arith.addf %12, %93 : vector<8x128xf32>
    %95 = arith.addf %90, %92 : vector<8x128xf32>
    %96 = arith.addf %12, %95 : vector<8x128xf32>
    %97 = arith.mulf %37, %49 : vector<8x128xf32>
    %c3_i32 = arith.constant 3 : i32
    %98 = vector.broadcast %c3_i32 : i32 to vector<8x128xi32>
    %99 = arith.cmpi eq, %52, %98 : vector<8x128xi32>
    %100 = arith.extui %99 : vector<8x128xi1> to vector<8x128xi32>
    %101 = arith.sitofp %100 : vector<8x128xi32> to vector<8x128xf32>
    %cst_24 = arith.constant 0.000000e+00 : f32
    %102 = vector.broadcast %cst_24 : f32 to vector<8x128xf32>
    %103 = arith.select %57, %97, %102 : vector<8x128xi1>, vector<8x128xf32>
    %cst_25 = arith.constant 0.000000e+00 : f32
    %104 = vector.broadcast %cst_25 : f32 to vector<8x128xf32>
    %105 = arith.select %57, %101, %104 : vector<8x128xi1>, vector<8x128xf32>
    %106 = arith.mulf %103, %105 : vector<8x128xf32>
    %107 = arith.addf %12, %106 : vector<8x128xf32>
    %108 = arith.addf %103, %105 : vector<8x128xf32>
    %109 = arith.addf %12, %108 : vector<8x128xf32>
    %c1_i32_26 = arith.constant 1 : i32
    %c0_27 = arith.constant 0 : index
    %c0_28 = arith.constant 0 : index
    %c0_29 = arith.constant 0 : index
    %c0_30 = arith.constant 0 : index
    %c0_31 = arith.constant 0 : index
    %110 = vector.load %arg5[%c0_27, %c0_28, %c0_29, %c0_30, %c0_31] : memref<1x1x4x8x128xf32, #tpu.memory_space<vmem>>, vector<1x1x1x8x128xf32>
    %111 = vector.shape_cast %110 : vector<1x1x1x8x128xf32> to vector<8x128xf32>
    %112 = arith.addf %111, %68 : vector<8x128xf32>
    %c0_32 = arith.constant 0 : index
    %c0_33 = arith.constant 0 : index
    %c0_34 = arith.constant 0 : index
    %c0_35 = arith.constant 0 : index
    %c0_36 = arith.constant 0 : index
    %113 = vector.load %arg5[%c0_32, %c0_33, %c0_34, %c0_35, %c0_36] : memref<1x1x4x8x128xf32, #tpu.memory_space<vmem>>, vector<1x1x1x8x128xf32>
    %114 = vector.shape_cast %113 : vector<1x1x1x8x128xf32> to vector<8x128xf32>
    %115 = vector.shape_cast %112 : vector<8x128xf32> to vector<1x1x1x8x128xf32>
    tpu.vector_store %arg5[%c0_32, %c0_33, %c0_34, %c0_35, %c0_36], %115 {strides = array<i32>} : memref<1x1x4x8x128xf32, #tpu.memory_space<vmem>>, vector<1x1x1x8x128xf32>,
    %c0_37 = arith.constant 0 : index
    %c0_38 = arith.constant 0 : index
    %c0_39 = arith.constant 0 : index
    %c0_40 = arith.constant 0 : index
    %c0_41 = arith.constant 0 : index
    %116 = vector.load %arg6[%c0_37, %c0_38, %c0_39, %c0_40, %c0_41] : memref<1x1x4x8x128xf32, #tpu.memory_space<vmem>>, vector<1x1x1x8x128xf32>
    %117 = vector.shape_cast %116 : vector<1x1x1x8x128xf32> to vector<8x128xf32>
    %118 = arith.addf %117, %70 : vector<8x128xf32>
    %c0_42 = arith.constant 0 : index
    %c0_43 = arith.constant 0 : index
    %c0_44 = arith.constant 0 : index
    %c0_45 = arith.constant 0 : index
    %c0_46 = arith.constant 0 : index
    %119 = vector.load %arg6[%c0_42, %c0_43, %c0_44, %c0_45, %c0_46] : memref<1x1x4x8x128xf32, #tpu.memory_space<vmem>>, vector<1x1x1x8x128xf32>
    %120 = vector.shape_cast %119 : vector<1x1x1x8x128xf32> to vector<8x128xf32>
    %121 = vector.shape_cast %118 : vector<8x128xf32> to vector<1x1x1x8x128xf32>
    tpu.vector_store %arg6[%c0_42, %c0_43, %c0_44, %c0_45, %c0_46], %121 {strides = array<i32>} : memref<1x1x4x8x128xf32, #tpu.memory_space<vmem>>, vector<1x1x1x8x128xf32>,
    %c0_47 = arith.constant 0 : index
    %c0_48 = arith.constant 0 : index
    %c1_49 = arith.constant 1 : index
    %c0_50 = arith.constant 0 : index
    %c0_51 = arith.constant 0 : index
    %122 = vector.load %arg5[%c0_47, %c0_48, %c1_49, %c0_50, %c0_51] : memref<1x1x4x8x128xf32, #tpu.memory_space<vmem>>, vector<1x1x1x8x128xf32>
    %123 = vector.shape_cast %122 : vector<1x1x1x8x128xf32> to vector<8x128xf32>
    %124 = arith.addf %123, %81 : vector<8x128xf32>
    %c0_52 = arith.constant 0 : index
    %c0_53 = arith.constant 0 : index
    %c1_54 = arith.constant 1 : index
    %c0_55 = arith.constant 0 : index
    %c0_56 = arith.constant 0 : index
    %125 = vector.load %arg5[%c0_52, %c0_53, %c1_54, %c0_55, %c0_56] : memref<1x1x4x8x128xf32, #tpu.memory_space<vmem>>, vector<1x1x1x8x128xf32>
    %126 = vector.shape_cast %125 : vector<1x1x1x8x128xf32> to vector<8x128xf32>
    %127 = vector.shape_cast %124 : vector<8x128xf32> to vector<1x1x1x8x128xf32>
    tpu.vector_store %arg5[%c0_52, %c0_53, %c1_54, %c0_55, %c0_56], %127 {strides = array<i32>} : memref<1x1x4x8x128xf32, #tpu.memory_space<vmem>>, vector<1x1x1x8x128xf32>,
    %c0_57 = arith.constant 0 : index
    %c0_58 = arith.constant 0 : index
    %c1_59 = arith.constant 1 : index
    %c0_60 = arith.constant 0 : index
    %c0_61 = arith.constant 0 : index
    %128 = vector.load %arg6[%c0_57, %c0_58, %c1_59, %c0_60, %c0_61] : memref<1x1x4x8x128xf32, #tpu.memory_space<vmem>>, vector<1x1x1x8x128xf32>
    %129 = vector.shape_cast %128 : vector<1x1x1x8x128xf32> to vector<8x128xf32>
    %130 = arith.addf %129, %83 : vector<8x128xf32>
    %c0_62 = arith.constant 0 : index
    %c0_63 = arith.constant 0 : index
    %c1_64 = arith.constant 1 : index
    %c0_65 = arith.constant 0 : index
    %c0_66 = arith.constant 0 : index
    %131 = vector.load %arg6[%c0_62, %c0_63, %c1_64, %c0_65, %c0_66] : memref<1x1x4x8x128xf32, #tpu.memory_space<vmem>>, vector<1x1x1x8x128xf32>
    %132 = vector.shape_cast %131 : vector<1x1x1x8x128xf32> to vector<8x128xf32>
    %133 = vector.shape_cast %130 : vector<8x128xf32> to vector<1x1x1x8x128xf32>
    tpu.vector_store %arg6[%c0_62, %c0_63, %c1_64, %c0_65, %c0_66], %133 {strides = array<i32>} : memref<1x1x4x8x128xf32, #tpu.memory_space<vmem>>, vector<1x1x1x8x128xf32>,
    %c0_67 = arith.constant 0 : index
    %c0_68 = arith.constant 0 : index
    %c2_69 = arith.constant 2 : index
    %c0_70 = arith.constant 0 : index
    %c0_71 = arith.constant 0 : index
    %134 = vector.load %arg5[%c0_67, %c0_68, %c2_69, %c0_70, %c0_71] : memref<1x1x4x8x128xf32, #tpu.memory_space<vmem>>, vector<1x1x1x8x128xf32>
    %135 = vector.shape_cast %134 : vector<1x1x1x8x128xf32> to vector<8x128xf32>
    %136 = arith.addf %135, %94 : vector<8x128xf32>
    %c0_72 = arith.constant 0 : index
    %c0_73 = arith.constant 0 : index
    %c2_74 = arith.constant 2 : index
    %c0_75 = arith.constant 0 : index
    %c0_76 = arith.constant 0 : index
    %137 = vector.load %arg5[%c0_72, %c0_73, %c2_74, %c0_75, %c0_76] : memref<1x1x4x8x128xf32, #tpu.memory_space<vmem>>, vector<1x1x1x8x128xf32>
    %138 = vector.shape_cast %137 : vector<1x1x1x8x128xf32> to vector<8x128xf32>
    %139 = vector.shape_cast %136 : vector<8x128xf32> to vector<1x1x1x8x128xf32>
    tpu.vector_store %arg5[%c0_72, %c0_73, %c2_74, %c0_75, %c0_76], %139 {strides = array<i32>} : memref<1x1x4x8x128xf32, #tpu.memory_space<vmem>>, vector<1x1x1x8x128xf32>,
    %c0_77 = arith.constant 0 : index
    %c0_78 = arith.constant 0 : index
    %c2_79 = arith.constant 2 : index
    %c0_80 = arith.constant 0 : index
    %c0_81 = arith.constant 0 : index
    %140 = vector.load %arg6[%c0_77, %c0_78, %c2_79, %c0_80, %c0_81] : memref<1x1x4x8x128xf32, #tpu.memory_space<vmem>>, vector<1x1x1x8x128xf32>
    %141 = vector.shape_cast %140 : vector<1x1x1x8x128xf32> to vector<8x128xf32>
    %142 = arith.addf %141, %96 : vector<8x128xf32>
    %c0_82 = arith.constant 0 : index
    %c0_83 = arith.constant 0 : index
    %c2_84 = arith.constant 2 : index
    %c0_85 = arith.constant 0 : index
    %c0_86 = arith.constant 0 : index
    %143 = vector.load %arg6[%c0_82, %c0_83, %c2_84, %c0_85, %c0_86] : memref<1x1x4x8x128xf32, #tpu.memory_space<vmem>>, vector<1x1x1x8x128xf32>
    %144 = vector.shape_cast %143 : vector<1x1x1x8x128xf32> to vector<8x128xf32>
    %145 = vector.shape_cast %142 : vector<8x128xf32> to vector<1x1x1x8x128xf32>
    tpu.vector_store %arg6[%c0_82, %c0_83, %c2_84, %c0_85, %c0_86], %145 {strides = array<i32>} : memref<1x1x4x8x128xf32, #tpu.memory_space<vmem>>, vector<1x1x1x8x128xf32>,
    %c0_87 = arith.constant 0 : index
    %c0_88 = arith.constant 0 : index
    %c3_89 = arith.constant 3 : index
    %c0_90 = arith.constant 0 : index
    %c0_91 = arith.constant 0 : index
    %146 = vector.load %arg5[%c0_87, %c0_88, %c3_89, %c0_90, %c0_91] : memref<1x1x4x8x128xf32, #tpu.memory_space<vmem>>, vector<1x1x1x8x128xf32>
    %147 = vector.shape_cast %146 : vector<1x1x1x8x128xf32> to vector<8x128xf32>
    %148 = arith.addf %147, %107 : vector<8x128xf32>
    %c0_92 = arith.constant 0 : index
    %c0_93 = arith.constant 0 : index
    %c3_94 = arith.constant 3 : index
    %c0_95 = arith.constant 0 : index
    %c0_96 = arith.constant 0 : index
    %149 = vector.load %arg5[%c0_92, %c0_93, %c3_94, %c0_95, %c0_96] : memref<1x1x4x8x128xf32, #tpu.memory_space<vmem>>, vector<1x1x1x8x128xf32>
    %150 = vector.shape_cast %149 : vector<1x1x1x8x128xf32> to vector<8x128xf32>
    %151 = vector.shape_cast %148 : vector<8x128xf32> to vector<1x1x1x8x128xf32>
    tpu.vector_store %arg5[%c0_92, %c0_93, %c3_94, %c0_95, %c0_96], %151 {strides = array<i32>} : memref<1x1x4x8x128xf32, #tpu.memory_space<vmem>>, vector<1x1x1x8x128xf32>,
    %c0_97 = arith.constant 0 : index
    %c0_98 = arith.constant 0 : index
    %c3_99 = arith.constant 3 : index
    %c0_100 = arith.constant 0 : index
    %c0_101 = arith.constant 0 : index
    %152 = vector.load %arg6[%c0_97, %c0_98, %c3_99, %c0_100, %c0_101] : memref<1x1x4x8x128xf32, #tpu.memory_space<vmem>>, vector<1x1x1x8x128xf32>
    %153 = vector.shape_cast %152 : vector<1x1x1x8x128xf32> to vector<8x128xf32>
    %154 = arith.addf %153, %109 : vector<8x128xf32>
    %c0_102 = arith.constant 0 : index
    %c0_103 = arith.constant 0 : index
    %c3_104 = arith.constant 3 : index
    %c0_105 = arith.constant 0 : index
    %c0_106 = arith.constant 0 : index
    %155 = vector.load %arg6[%c0_102, %c0_103, %c3_104, %c0_105, %c0_106] : memref<1x1x4x8x128xf32, #tpu.memory_space<vmem>>, vector<1x1x1x8x128xf32>
    %156 = vector.shape_cast %155 : vector<1x1x1x8x128xf32> to vector<8x128xf32>
    %157 = vector.shape_cast %154 : vector<8x128xf32> to vector<1x1x1x8x128xf32>
    tpu.vector_store %arg6[%c0_102, %c0_103, %c3_104, %c0_105, %c0_106], %157 {strides = array<i32>} : memref<1x1x4x8x128xf32, #tpu.memory_space<vmem>>, vector<1x1x1x8x128xf32>,
    return
  }
  func.func @transform_0(%arg0: i32, %arg1: i32, %arg2: i32) -> (i32, i32, i32, i32) {
    %c1_i32 = arith.constant 1 : i32
    %0 = arith.muli %arg0, %c1_i32 : i32
    %1 = arith.addi %0, %arg2 : i32
    %c0_i32 = arith.constant 0 : i32
    %2 = arith.minsi %1, %c0_i32 : i32
    %c0_i32_0 = arith.constant 0 : i32
    %c0_i32_1 = arith.constant 0 : i32
    %c0_i32_2 = arith.constant 0 : i32
    return %arg1, %c0_i32_0, %2, %c0_i32_1 : i32, i32, i32, i32
  }
  func.func @transform_1(%arg0: i32, %arg1: i32, %arg2: i32) -> (i32, i32, i32, i32) {
    %c1_i32 = arith.constant 1 : i32
    %0 = arith.muli %arg0, %c1_i32 : i32
    %1 = arith.addi %0, %arg2 : i32
    %c0_i32 = arith.constant 0 : i32
    %2 = arith.minsi %1, %c0_i32 : i32
    %c0_i32_0 = arith.constant 0 : i32
    %c0_i32_1 = arith.constant 0 : i32
    %c0_i32_2 = arith.constant 0 : i32
    return %arg1, %c0_i32_0, %2, %c0_i32_1 : i32, i32, i32, i32
  }
  func.func @transform_2(%arg0: i32, %arg1: i32, %arg2: i32) -> (i32, i32, i32, i32, i32) {
    %c0_i32 = arith.constant 0 : i32
    %c0_i32_0 = arith.constant 0 : i32
    %c0_i32_1 = arith.constant 0 : i32
    %c0_i32_2 = arith.constant 0 : i32
    return %arg0, %arg1, %c0_i32, %c0_i32_0, %c0_i32_1 : i32, i32, i32, i32, i32
  }
  func.func @transform_3(%arg0: i32, %arg1: i32, %arg2: i32) -> (i32, i32, i32, i32, i32) {
    %c0_i32 = arith.constant 0 : i32
    %c0_i32_0 = arith.constant 0 : i32
    %c0_i32_1 = arith.constant 0 : i32
    %c0_i32_2 = arith.constant 0 : i32
    return %arg0, %arg1, %c0_i32, %c0_i32_0, %c0_i32_1 : i32, i32, i32, i32, i32
  }
}

</mosaic_0001>

<bundles_post_ra>
// kernel: dice_loss.1
= control target key start
LH: loop header
LB: loop body
LE: loop exit
PB: predicated region body
PF: predicated region fallthrough
CT: control target
= control target key end

     0   :  { %s712_s12 = smov 0   ;;  %s714_s13 = smov 0   ;;  %s768_s0 = inlined_call_operand.vmem [shape: f32[2,4,8,128], index: 0, kind: input, shape index: {}]   ;;  %s769_s1 = inlined_call_operand.vmem [shape: s32[2,1,8,128], index: 1, kind: input, shape index: {}]   ;;  %s770_s2 = inlined_call_operand.vmem [shape: f32[1,2,4,8,128], index: 2, kind: output, shape index: {0}]   ;;  %s771_s3 = inlined_call_operand.vmem [shape: f32[1,2,4,8,128], index: 3, kind: output, shape index: {1}]  }
   0x1   :  { %s716_s14 = smov 0  }
   0x2 LB: > { %s29_s15 = sadd.s32 1, %s685_s13  ;;  %p600_p0 = scmp.ge.s32.totalorder %s689_s14, 1  ;;  %s689_s14 = sphi %s716_s14, %s14_s14   ;;  %s685_s13 = sphi %s714_s13, %s773_s13   ;;  %s681_s12 = sphi %s712_s12, %s772_s12  }
   0x3   : > { %p31_p1 = scmp.ge.s32.totalorder %s29_s15, 2  ;;  %p206_p2 = scmp.lt.s32.totalorder %s689_s14, 3 }
   0x5   : > { %s775_s15 = smov (%p31_p1, %s29_s15), 0  ;;  %p207_p3 = pnand %p600_p0, %p206_p2 }
   0x6   : > { %p262_p4 = scmp.lt.s32.totalorder (!%p207_p3), %s681_s12, 1  ;;  %v318_v22 = vlaneseq (!%p207_p3)  ;;  %v691_v34 = vmov (!%p207_p3), 0.0  }
   0x7   : > { %210 = sbr.rel (%p207_p3) target bundleno = 78 (0x4e), region = 28 }
   0x8   : > { %v319_v23 = vshrl.u32 (!%p207_p3), %v318_v22, 7  ;;  %v321_v25 = vand.u32 (!%p207_p3), 127, %v318_v22 }
   0xa   : > { %v322_v26 = vmul.u32 (!%p207_p3), 128, %v319_v23 }
   0xc   : > { %v323_v30 = vadd.s32 (!%p207_p3), %v322_v26, %v321_v25 }
   0xe   : > { %s777_s12 = smov (!%p262_p4, %s681_s12), 1  ;;  %vm362_vm4 = vcmp.lt.s32.totalorder %v323_v30, 256 }
   0xf   : > { %s733_s16 = sshll.u32 %s777_s12, 5  ;;  %s603_s20 = sshll.u32 %s777_s12, 3 }
  0x10   : > { %s269_s19 = scalar_lea.vmem %s768_s0, %s733_s16  ;;  %s282_s23 = scalar_lea.vmem %s769_s1, %s603_s20 }
  0x11   : > { %v325_v0 = vld [vmem:[%s269_s19] sm:$0xff]  ;;  %v608_v1 = vld [vmem:[%s269_s19 + $0x8] sm:$0xff]  ;;  %v609_v2 = vld [vmem:[%s269_s19 + $0x10] sm:$0xff]  ;;  %s294_s26 = scalar_lea.vmem %s770_s2, %s733_s16  ;;  %s303_s29 = scalar_lea.vmem %s771_s3, %s733_s16 }
  0x12   : > { %v335_v3 = vmax.f32 %v325_v0, %v608_v1  ;;  %v610_v4 = vld [vmem:[%s269_s19 + $0x18] sm:$0xff]  ;;  %v360_v29 = vld [vmem:[%s282_s23] sm:$0xff] }
  0x13   : > { %vm364_vm0 = vcmp.eq.s32.totalorder %v360_v29, 0  ;;  %vm374_vm1 = vcmp.eq.s32.totalorder %v360_v29, 1  ;;  %vm384_vm2 = vcmp.eq.s32.totalorder %v360_v29, 2  ;;  %vm394_vm3 = vcmp.eq.s32.totalorder %v360_v29, 3 }
  0x14   : > { %v336_v5 = vmax.f32 %v335_v3, %v609_v2  ;;  %v611_v35 = vsel %vm364_vm0, 1.0, %v691_v34  ;;  %v612_v36 = vsel %vm374_vm1, 1.0, %v691_v34  ;;  %v613_v38 = vsel %vm384_vm2, 1.0, %v691_v34 }
  0x15   : > { %v614_v39 = vsel %vm394_vm3, 1.0, %v691_v34  ;;  %v368_v40 = vsel %vm362_vm4, %v611_v35, 0.0  ;;  %v378_v41 = vsel %vm362_vm4, %v612_v36, 0.0  ;;  %v388_v46 = vsel %vm362_vm4, %v613_v38, 0.0 }
  0x16   : > { %v337_v6 = vmax.f32 %v336_v5, %v610_v4  ;;  %v398_v47 = vsel %vm362_vm4, %v614_v39, 0.0 }
  0x18   : > { %v338_v7 = vsub.f32 %v325_v0, %v337_v6  ;;  %v341_v8 = vsub.f32 %v608_v1, %v337_v6  ;;  %v344_v9 = vsub.f32 %v609_v2, %v337_v6  ;;  %v347_v10 = vsub.f32 %v610_v4, %v337_v6 }
  0x1a   : > { %v339_v11 = vmul.f32 1.442695, %v338_v7  ;;  %v342_v12 = vmul.f32 1.442695, %v341_v8  ;;  %v345_v13 = vmul.f32 1.442695, %v344_v9 }
  0x1b   : > { %v348_v14 = vmul.f32 1.442695, %v347_v10 }
  0x1c   : > { %657 = vpow2.f32 %v339_v11 }
  0x1d   : > { %659 = vpow2.f32 %v342_v12 }
  0x1e   : > { %661 = vpow2.f32 %v345_v13 }
  0x1f   : > { %663 = vpow2.f32 %v348_v14 }
  0x26   : > { %v658_v15 = vpop.eup %657 }
  0x27   : > { %v660_v16 = vpop.eup %659 }
  0x28   : > { %v662_v17 = vpop.eup %661  ;;  %v350_v18 = vadd.f32 %v660_v16, %v658_v15 }
  0x29   : > { %v664_v19 = vpop.eup %663 }
  0x2a   : > { %v351_v20 = vadd.f32 %v662_v17, %v350_v18 }
  0x2c   : > { %v352_v21 = vadd.f32 %v664_v19, %v351_v20 }
  0x2e   : > { %665 = vrcp.f32 %v352_v21 }
  0x38   : > { %v666_v24 = vpop.eup %665 }
  0x39   : > { %v354_v27 = vmul.f32 %v666_v24, %v352_v21 }
  0x3b   : > { %v355_v28 = vsub.f32 2.0, %v354_v27 }
  0x3d   : > { %v356_v31 = vmul.f32 %v666_v24, %v355_v28 }
  0x3f   : > { %v357_v32 = vmul.f32 %v356_v31, %v352_v21 }
  0x41   : > { %v358_v33 = vsub.f32 2.0, %v357_v32 }
  0x43   : > { %v359_v37 = vmul.f32 %v358_v33, %v356_v31 }
  0x45   : > { %v363_v42 = vmul.f32 %v658_v15, %v359_v37  ;;  %v373_v43 = vmul.f32 %v660_v16, %v359_v37  ;;  %v383_v44 = vmul.f32 %v662_v17, %v359_v37  ;;  %v393_v45 = vmul.f32 %v664_v19, %v359_v37 }
  0x47   : > { %v367_v48 = vsel %vm362_vm4, %v363_v42, 0.0  ;;  %v377_v49 = vsel %vm362_vm4, %v373_v43, 0.0  ;;  %v387_v50 = vsel %vm362_vm4, %v383_v44, 0.0  ;;  %v397_v51 = vsel %vm362_vm4, %v393_v45, 0.0 }
  0x48   : > { %v369_v52 = vmul.f32 %v368_v40, %v367_v48  ;;  %v371_v53 = vadd.f32 %v368_v40, %v367_v48  ;;  %v379_v54 = vmul.f32 %v378_v41, %v377_v49  ;;  %v381_v55 = vadd.f32 %v378_v41, %v377_v49 }
  0x49   : > { %v389_v56 = vmul.f32 %v388_v46, %v387_v50  ;;  %v391_v57 = vadd.f32 %v388_v46, %v387_v50  ;;  %v399_v58 = vmul.f32 %v398_v47, %v397_v51  ;;  %v401_v59 = vadd.f32 %v398_v47, %v397_v51 }
  0x4a   : > { %405 = vst [vmem:[%s294_s26] sm:$0xff] %v369_v52  ;;  %408 = vst [vmem:[%s303_s29] sm:$0xff] %v371_v53 }
  0x4b   : > { %616 = vst [vmem:[%s294_s26 + $0x8] sm:$0xff] %v379_v54  ;;  %618 = vst [vmem:[%s303_s29 + $0x8] sm:$0xff] %v381_v55 }
  0x4c   : > { %620 = vst [vmem:[%s294_s26 + $0x10] sm:$0xff] %v389_v56  ;;  %622 = vst [vmem:[%s303_s29 + $0x10] sm:$0xff] %v391_v57 }
  0x4d   : > { %624 = vst [vmem:[%s294_s26 + $0x18] sm:$0xff] %v399_v58  ;;  %626 = vst [vmem:[%s303_s29 + $0x18] sm:$0xff] %v401_v59 }
  0x4e PF: > { %s14_s14 = sadd.s32 1, %s689_s14   ;;  %s772_s12 = smov %s685_s13 }
  0x4f   : > { %p11_p5 = scmp.ge.s32.totalorder %s14_s14, 4   ;;  %s773_s13 = smov %s775_s15 }
  0x51   :  { %13 = sbr.rel (!%p11_p5) target bundleno = 2 (0x2), region = 86 }

</bundles_post_ra>
